<compile_context>
chip_gen: v7x
topology: tpu7x:2x2x1
jax: 0.10.0
libtpu: 0.0.40
codegen_flags: <defaults>
</compile_context>

<pallas_src>
import jax
import jax.numpy as jnp
from jax.experimental import pallas as pl
from jax.experimental.pallas import tpu as pltpu


def _sum_depth_kernel(x_ref, o_ref, xp_ref):
    """All-ones 3x3 box-sum (conv, padding=1) for a block of whole images.

    x_ref  : VMEM (B, H, W)       input block
    o_ref  : VMEM (B, H, W)       output block
    xp_ref : VMEM (B, H+2, W+2)   f32 scratch used as an in-VMEM padded copy
    """
    B, H, W = o_ref.shape

    # In-VMEM zero padding (fused: no padded copy ever touches HBM).  The slab
    # is re-zeroed every step so the kernel is stateless per grid iteration
    # (safe under megacore "parallel" splitting of the batch axis).
    xp_ref[...] = jnp.zeros_like(xp_ref)
    xp_ref[:, pl.ds(1, H), pl.ds(1, W)] = x_ref[...].astype(jnp.float32)
    xp = xp_ref[...]

    # Separable all-ones 3x3 sum: 1x3 horizontal pass, then 3x1 vertical pass.
    h = xp[:, :, 0:W] + xp[:, :, 1:W + 1] + xp[:, :, 2:W + 2]        # (B, H+2, W)
    out = h[:, 0:H, :] + h[:, 1:H + 1, :] + h[:, 2:H + 2, :]         # (B, H, W)

    o_ref[...] = out.astype(o_ref.dtype)


def _choose_batch_tile(N, H, W, itemsize):
    """How many whole images to process per grid step."""
    img_bytes = H * W * itemsize
    # Per-image VMEM footprint: double-buffered input + output blocks, plus
    # the (single-buffered) padded f32 scratch slab.
    per_img = 4 * img_bytes + (H + 2) * (W + 2) * 4
    budget = 24 * 1024 * 1024  # stay well inside v7x's 64 MiB physical VMEM
    b = min(N, max(1, budget // per_img))
    # If the whole batch fits in one step but each image carries real work,
    # split into two steps so both TensorCores get a share and the in/out
    # DMAs of neighbouring steps overlap.
    if b == N and N > 1 and img_bytes >= 512 * 1024:
        b = pl.cdiv(N, 2)
    return b


def sum_depth_forward(x):
    """x: (N, 1, H, W) -> (N, 1, H, W), 3x3 all-ones box sum (padding=1)."""
    N, C, H, W = x.shape
    assert C == 1, "Sum_depth expects a single input channel"

    x_sq = x[:, 0, :, :]  # (N, H, W), channel squeeze (layout no-op)

    itemsize = jnp.dtype(x.dtype).itemsize
    b_tile = _choose_batch_tile(N, H, W, itemsize)
    grid = (pl.cdiv(N, b_tile),)  # edge block (if any) is masked by Pallas

    out = pl.pallas_call(
        _sum_depth_kernel,
        out_shape=jax.ShapeDtypeStruct((N, H, W), x.dtype),
        grid_spec=pltpu.PrefetchScalarGridSpec(
            num_scalar_prefetch=0,
            grid=grid,
            in_specs=[
                pl.BlockSpec((b_tile, H, W), lambda b: (b, 0, 0)),
            ],
            out_specs=pl.BlockSpec((b_tile, H, W), lambda b: (b, 0, 0)),
            scratch_shapes=[
                pltpu.VMEM((b_tile, H + 2, W + 2), jnp.float32),
            ],
        ),
        compiler_params=pltpu.CompilerParams(
            dimension_semantics=("parallel",),
            vmem_limit_bytes=64 * 1024 * 1024,
        ),
        cost_estimate=pl.CostEstimate(
            flops=9 * N * H * W,
            transcendentals=0,
            bytes_accessed=2 * N * H * W * itemsize,
        ),
    )(x_sq)

    # out.contiguous().view(-1, 1, H, W)  ==  (N, 1, H, W) for C=1.
    return out.reshape(-1, 1, H, W)


def sum_depth_reference(x):
    """Plain-JAX reference (same math) for a correctness check."""
    N, C, H, W = x.shape
    xp = jnp.pad(x[:, 0].astype(jnp.float32), ((0, 0), (1, 1), (1, 1)))
    acc = jnp.zeros((N, H, W), jnp.float32)
    for di in range(3):
        for dj in range(3):
            acc = acc + xp[:, di:di + H, dj:dj + W]
    return acc.astype(x.dtype).reshape(-1, 1, H, W)


if __name__ == "__main__":
    key = jax.random.PRNGKey(0)
    N, C, H, W = 2, 1, 16, 16
    x = jax.random.normal(key, (N, C, H, W), dtype=jnp.float32)

    out = sum_depth_forward(x)
    out = jax.block_until_ready(out)

    ref = sum_depth_reference(x)
    assert out.shape == (N, 1, H, W), out.shape
    assert jnp.allclose(out, ref, atol=1e-5, rtol=1e-5), "mismatch vs reference"

    print("KERNEL_OK")
</pallas_src>

<mosaic_0001>
module attributes {stable_mosaic.version = 11 : i64} {
  func.func @_sum_depth_kernel(%arg0: i32, %arg1: memref<2x16x16xf32, #tpu.memory_space<vmem>>, %arg2: memref<2x16x16xf32, #tpu.memory_space<vmem>>, %arg3: memref<2x18x18xf32, #tpu.memory_space<vmem>>) attributes {dimension_semantics = [#tpu.dimension_semantics<parallel>], iteration_bounds = array<i64: 1>, scalar_prefetch = 0 : i64, scratch_operands = 1 : i64, tpu.core_type = #tpu.core_type<tc>, window_params = [{transform_indices = @transform_0, window_bounds = array<i64: 2, 16, 16>}, {transform_indices = @transform_1, window_bounds = array<i64: 2, 16, 16>}]} {
    %cst = arith.constant 0.000000e+00 : f32
    %0 = vector.broadcast %cst : f32 to vector<2x18x18xf32>
    %c0 = arith.constant 0 : index
    %c0_0 = arith.constant 0 : index
    %c0_1 = arith.constant 0 : index
    %1 = vector.load %arg3[%c0, %c0_0, %c0_1] : memref<2x18x18xf32, #tpu.memory_space<vmem>>, vector<2x18x18xf32>
    tpu.vector_store %arg3[%c0, %c0_0, %c0_1], %0 {strides = array<i32>} : memref<2x18x18xf32, #tpu.memory_space<vmem>>, vector<2x18x18xf32>,
    %c0_2 = arith.constant 0 : index
    %c0_3 = arith.constant 0 : index
    %c0_4 = arith.constant 0 : index
    %2 = vector.load %arg1[%c0_2, %c0_3, %c0_4] : memref<2x16x16xf32, #tpu.memory_space<vmem>>, vector<2x16x16xf32>
    %c0_5 = arith.constant 0 : index
    %c1 = arith.constant 1 : index
    %c1_6 = arith.constant 1 : index
    %3 = vector.load %arg3[%c0_5, %c1, %c1_6] : memref<2x18x18xf32, #tpu.memory_space<vmem>>, vector<2x16x16xf32>
    tpu.vector_store %arg3[%c0_5, %c1, %c1_6], %2 {strides = array<i32>} : memref<2x18x18xf32, #tpu.memory_space<vmem>>, vector<2x16x16xf32>,
    %c0_7 = arith.constant 0 : index
    %c0_8 = arith.constant 0 : index
    %c0_9 = arith.constant 0 : index
    %4 = vector.load %arg3[%c0_7, %c0_8, %c0_9] : memref<2x18x18xf32, #tpu.memory_space<vmem>>, vector<2x18x18xf32>
    %5 = vector.extract_strided_slice %4 {offsets = [0, 0, 0], sizes = [2, 18, 16], strides = [1, 1, 1]} : vector<2x18x18xf32> to vector<2x18x16xf32>
    %6 = vector.extract_strided_slice %4 {offsets = [0, 0, 1], sizes = [2, 18, 16], strides = [1, 1, 1]} : vector<2x18x18xf32> to vector<2x18x16xf32>
    %7 = arith.addf %5, %6 : vector<2x18x16xf32>
    %8 = vector.extract_strided_slice %4 {offsets = [0, 0, 2], sizes = [2, 18, 16], strides = [1, 1, 1]} : vector<2x18x18xf32> to vector<2x18x16xf32>
    %9 = arith.addf %7, %8 : vector<2x18x16xf32>
    %10 = vector.extract_strided_slice %9 {offsets = [0, 0, 0], sizes = [2, 16, 16], strides = [1, 1, 1]} : vector<2x18x16xf32> to vector<2x16x16xf32>
    %11 = vector.extract_strided_slice %9 {offsets = [0, 1, 0], sizes = [2, 16, 16], strides = [1, 1, 1]} : vector<2x18x16xf32> to vector<2x16x16xf32>
    %12 = arith.addf %10, %11 : vector<2x16x16xf32>
    %13 = vector.extract_strided_slice %9 {offsets = [0, 2, 0], sizes = [2, 16, 16], strides = [1, 1, 1]} : vector<2x18x16xf32> to vector<2x16x16xf32>
    %14 = arith.addf %12, %13 : vector<2x16x16xf32>
    %c0_10 = arith.constant 0 : index
    %c0_11 = arith.constant 0 : index
    %c0_12 = arith.constant 0 : index
    %15 = vector.load %arg2[%c0_10, %c0_11, %c0_12] : memref<2x16x16xf32, #tpu.memory_space<vmem>>, vector<2x16x16xf32>
    tpu.vector_store %arg2[%c0_10, %c0_11, %c0_12], %14 {strides = array<i32>} : memref<2x16x16xf32, #tpu.memory_space<vmem>>, vector<2x16x16xf32>,
    return
  }
  func.func @transform_0(%arg0: i32) -> (i32, i32, i32) {
    %c0_i32 = arith.constant 0 : i32
    %c0_i32_0 = arith.constant 0 : i32
    %c0_i32_1 = arith.constant 0 : i32
    return %arg0, %c0_i32, %c0_i32_0 : i32, i32, i32
  }
  func.func @transform_1(%arg0: i32) -> (i32, i32, i32) {
    %c0_i32 = arith.constant 0 : i32
    %c0_i32_0 = arith.constant 0 : i32
    %c0_i32_1 = arith.constant 0 : i32
    return %arg0, %c0_i32, %c0_i32_0 : i32, i32, i32
  }
}

</mosaic_0001>

<bundles_post_ra>
// kernel: tpu_custom_call.1
= control target key start
LH: loop header
LB: loop body
LE: loop exit
PB: predicated region body
PF: predicated region fallthrough
CT: control target
= control target key end

     0   :  { %6 = vsyncpa [#allocation4], 0  ;;  %s298_s0 = inlined_call_operand.hbm [shape: f32[2,16,16], index: 0, kind: input, shape index: {}]   ;;  %s299_s1 = inlined_call_operand.hbm [shape: f32[2,16,16], index: 1, kind: output, shape index: {}]  }
   0x1   :  { %7 = vsyncpa [#allocation5], 0  ;;  %s238_s6 = smov [#allocation3]   ;;  %s190_s10 = scalar_lea.hbm %s298_s0, 512 }
   0x2   :  { %s13_s7 = sshll.u32 %s238_s6, 4  ;;  %p191_p0 = scmp.ne.s32.totalorder %s298_s0, %s190_s10  ;;  %s14_s7 = int_to_ptr.vmem [resolvable:$true] %s13_s7 }
   0x3   :  { %p194_p1 = scmp.lt.u32.totalorder %s190_s10, %s298_s0 }
   0x5   :  { %p196_p2 = pnand %p194_p1, %p191_p0 }
   0x7   :  { %199 = shalt.err (!%p196_p2)
}
   0x8   :  { %s200_s15 = scalar_lea.vmem %s14_s7, 512  ;;  %p205_p4 = scmp.lt.s32.totalorder %s14_s7, %s14_s7 }
   0x9   :  { %p201_p3 = scmp.ne.s32.totalorder %s14_s7, %s200_s15  ;;  %p206_p5 = scmp.lt.s32.totalorder %s200_s15, %s200_s15 }
   0xb   :  { %p207_p6 = por %p206_p5, %p205_p4 }
   0xd   :  { %p208_p7 = pnand %p207_p6, %p201_p3 }
   0xf   :  { %211 = shalt.err (!%p208_p7)
}
  0x10   :  { %s239_s16 = smov 128   ;;  %s240_s17 = smov 8  }
  0x11   :  { %19 = dma.hbm_to_vmem [thread:$0]  %s298_s0, 512, %s14_s7, [#allocation4], %s239_s16, %s239_s16, %s240_s17  }
  0x12   :  { %234 = dma.done.wait [#allocation4], 512  }
  0x13   :  { %235 = vsyncadd [#allocation4], 4294966784  ;;  %vm23_vm0 = vcmask 146432   ;;  %v241_v0 = vmov 0.0   ;;  %vm26_vm1 = vcmask 140288   ;;  %v31_v1 = vld [vmem:[#allocation3] sm:$0xff] }
  0x14   :  { %24 = vst.msk [vmem:[#allocation2] sm:$0xff] %vm23_vm0, %v241_v0  ;;  %25 = vst.msk [vmem:[#allocation2 + $0x8] sm:$0xff] %vm23_vm0, %v241_v0  ;;  %v33_v2 = vld [vmem:[#allocation3 + $0x10] sm:$0xff]  ;;  %s242_s20 = smov 1   ;;  %v32_v3 = vld [vmem:[#allocation3 + $0x8] sm:$0xff]  ;;  %vm51_vm2 = vcmask 138248  }
  0x15   :  { %28 = vst.msk [vmem:[#allocation2 + $0x18] sm:$0xff] %vm23_vm0, %v241_v0  ;;  %29 = vst.msk [vmem:[#allocation2 + $0x20] sm:$0xff] %vm23_vm0, %v241_v0  ;;  %39 = vrot.lane.b32.xlu0 %v31_v1, %s242_s20  ;;  %43 = vrot.lane.b32.xlu1 %v33_v2, %s242_s20  ;;  %v34_v4 = vld [vmem:[#allocation3 + $0x18] sm:$0xff]  ;;  %s243_s0 = smov 127   ;;  %s244_s21 = smov 126   ;;  %vm122_vm3 = vcmask 1046528  }
  0x16   :  { %27 = vst.msk [vmem:[#allocation2 + $0x10] sm:$0x3] %vm26_vm1, %v241_v0  ;;  %30 = vst.msk [vmem:[#allocation2 + $0x28] sm:$0x3] %vm26_vm1, %v241_v0  ;;  %vm141_vm4 = vcmask 1045504   ;;  %vm160_vm5 = vcmask 130048  }
  0x17   :  { %s245_s22 = smov [#allocation6]  }
  0x18   :  { %s170_s23 = sshll.u32 %s245_s22, 4  ;;  %s171_s23 = int_to_ptr.vmem [resolvable:$true] %s170_s23 }
  0x19   :  { %41 = vrot.lane.b32.xlu0 %v32_v3, %s242_s20  ;;  %45 = vrot.lane.b32.xlu1 %v34_v4, %s242_s20  ;;  %s212_s24 = scalar_lea.vmem %s171_s23, 512  ;;  %p217_p9 = scmp.lt.s32.totalorder %s171_s23, %s171_s23 }
  0x1a   :  { %p213_p8 = scmp.ne.s32.totalorder %s171_s23, %s212_s24  ;;  %p218_p10 = scmp.lt.s32.totalorder %s212_s24, %s212_s24 }
  0x1c   :  { %p219_p11 = por %p218_p10, %p217_p9 }
  0x1e   :  { %p220_p12 = pnand %p219_p11, %p213_p8 }
  0x87   :  { %v40_v5 = vpop.permute.xlu0 %39  ;;  %v44_v6 = vpop.permute.xlu1 %43 }
  0x88   :  { %52 = vst.msk [vmem:[#allocation2 + $0x1] sm:$0xff] %vm51_vm2, %v40_v5  ;;  %54 = vst.msk [vmem:[#allocation2 + $0x19] sm:$0xff] %vm51_vm2, %v44_v6 }
  0x8b   :  { %v42_v7 = vpop.permute.xlu0 %41  ;;  %v46_v8 = vpop.permute.xlu1 %45 }
  0x8c   :  { %53 = vst.msk [vmem:[#allocation2 + $0x9] sm:$0xff] %vm51_vm2, %v42_v7  ;;  %55 = vst.msk [vmem:[#allocation2 + $0x21] sm:$0xff] %vm51_vm2, %v46_v8 }
  0x8f   :  { %v56_v9 = vld [vmem:[#allocation2] sm:$0xff]  ;;  %v59_v12 = vld [vmem:[#allocation2 + $0x18] sm:$0xff] }
  0x90   :  { %68 = vrot.lane.b32.xlu0 %v56_v9, %s243_s0 }
  0x93   :  { %v57_v10 = vld [vmem:[#allocation2 + $0x8] sm:$0xff]  ;;  %v58_v11 = vld [vmem:[#allocation2 + $0x10] sm:$0x3]  ;;  %v60_v13 = vld [vmem:[#allocation2 + $0x20] sm:$0xff] }
  0x94   :  { %70 = vrot.lane.b32.xlu1 %v57_v10, %s243_s0  ;;  %72 = vrot.lane.b32.xlu0 %v58_v11, %s243_s0  ;;  %v61_v14 = vld [vmem:[#allocation2 + $0x28] sm:$0x3] }
  0x98   :  { %74 = vrot.lane.b32.xlu1 %v59_v12, %s243_s0  ;;  %76 = vrot.lane.b32.xlu0 %v60_v13, %s243_s0 }
  0x9c   :  { %78 = vrot.lane.b32.xlu1 %v61_v14, %s243_s0  ;;  %92 = vrot.lane.b32.xlu0 %v56_v9, %s244_s21 }
  0xa0   :  { %94 = vrot.lane.b32.xlu1 %v57_v10, %s244_s21  ;;  %96 = vrot.lane.b32.xlu0 %v58_v11, %s244_s21 }
  0xa4   :  { %98 = vrot.lane.b32.xlu1 %v59_v12, %s244_s21  ;;  %100 = vrot.lane.b32.xlu0 %v60_v13, %s244_s21 }
  0xa8   :  { %102 = vrot.lane.b32.xlu1 %v61_v14, %s244_s21 }
 0x102   :  { %v69_v15 = vpop.permute.xlu0 %68 }
 0x103   :  { %v86_v20 = vadd.f32 %v69_v15, %v56_v9 }
 0x106   :  { %v71_v16 = vpop.permute.xlu1 %70  ;;  %v73_v17 = vpop.permute.xlu0 %72 }
 0x107   :  { %v87_v24 = vadd.f32 %v71_v16, %v57_v10  ;;  %v88_v25 = vadd.f32 %v73_v17, %v58_v11 }
 0x10a   :  { %v75_v18 = vpop.permute.xlu1 %74  ;;  %v77_v19 = vpop.permute.xlu0 %76 }
 0x10b   :  { %v89_v35 = vadd.f32 %v75_v18, %v59_v12  ;;  %v90_v36 = vadd.f32 %v77_v19, %v60_v13 }
 0x10e   :  { %v79_v21 = vpop.permute.xlu1 %78  ;;  %v93_v22 = vpop.permute.xlu0 %92 }
 0x10f   :  { %v110_v23 = vadd.f32 %v93_v22, %v86_v20  ;;  %v91_v46 = vadd.f32 %v79_v21, %v61_v14 }
 0x111   :  { %v123_v30 = vrot.slane %v110_v23, 1  ;;  %v142_v39 = vrot.slane %v110_v23, 2 }
 0x112   :  { %v95_v26 = vpop.permute.xlu1 %94  ;;  %v97_v27 = vpop.permute.xlu0 %96 }
 0x113   :  { %v111_v28 = vadd.f32 %v95_v26, %v87_v24  ;;  %v112_v29 = vadd.f32 %v97_v27, %v88_v25 }
 0x115   :  { %v124_v31 = vrot.slane %v111_v28, 1  ;;  %v143_v32 = vrot.slane %v111_v28, 2  ;;  %v126_v33 = vrot.slane %v112_v29, 1  ;;  %v145_v34 = vrot.slane %v112_v29, 2 }
 0x116   :  { %v99_v37 = vpop.permute.xlu1 %98  ;;  %v101_v38 = vpop.permute.xlu0 %100 }
 0x117   :  { %v125_v40 = vsel %vm122_vm3, %v123_v30, %v124_v31  ;;  %v127_v41 = vsel %vm122_vm3, %v124_v31, %v126_v33  ;;  %v113_v44 = vadd.f32 %v99_v37, %v89_v35  ;;  %v114_v45 = vadd.f32 %v101_v38, %v90_v36 }
 0x118   :  { %v137_v42 = vadd.f32 %v125_v40, %v110_v23  ;;  %v138_v43 = vadd.f32 %v127_v41, %v111_v28  ;;  %v144_v47 = vsel %vm141_vm4, %v142_v39, %v143_v32  ;;  %v146_v48 = vsel %vm141_vm4, %v143_v32, %v145_v34 }
 0x119   :  { %v128_v51 = vrot.slane %v113_v44, 1  ;;  %v147_v53 = vrot.slane %v113_v44, 2  ;;  %v129_v54 = vrot.slane %v114_v45, 1  ;;  %v148_v55 = vrot.slane %v114_v45, 2 }
 0x11a   :  { %v156_v49 = vadd.f32 %v144_v47, %v137_v42  ;;  %v157_v50 = vadd.f32 %v146_v48, %v138_v43  ;;  %v103_v52 = vpop.permute.xlu1 %102 }
 0x11b   :  { %v115_v56 = vadd.f32 %v103_v52, %v91_v46  ;;  %v130_v57 = vsel %vm122_vm3, %v128_v51, %v129_v54  ;;  %v149_v61 = vsel %vm141_vm4, %v147_v53, %v148_v55 }
 0x11c   :  { %161 = vst.msk [vmem:[#allocation6] sm:$0xff] %vm160_vm5, %v156_v49  ;;  %162 = vst.msk [vmem:[#allocation6 + $0x8] sm:$0xff] %vm160_vm5, %v157_v50  ;;  %v139_v60 = vadd.f32 %v130_v57, %v113_v44 }
 0x11d   :  { %v131_v58 = vrot.slane %v115_v56, 1  ;;  %v150_v59 = vrot.slane %v115_v56, 2 }
 0x11e   :  { %v158_v63 = vadd.f32 %v149_v61, %v139_v60 }
 0x11f   :  { %v132_v62 = vsel %vm122_vm3, %v129_v54, %v131_v58  ;;  %v151_v1 = vsel %vm141_vm4, %v148_v55, %v150_v59 }
 0x120   :  { %v140_v0 = vadd.f32 %v132_v62, %v114_v45  ;;  %163 = vst.msk [vmem:[#allocation6 + $0x10] sm:$0xff] %vm160_vm5, %v158_v63 }
 0x122   :  { %v159_v2 = vadd.f32 %v151_v1, %v140_v0 }
 0x124   :  { %164 = vst.msk [vmem:[#allocation6 + $0x18] sm:$0xff] %vm160_vm5, %v159_v2 }
 0x125   :  { %223 = shalt.err (!%p220_p12)
}
 0x126   :  { %s224_s27 = scalar_lea.hbm %s299_s1, 512 }
 0x127   :  { %p225_p13 = scmp.ne.s32.totalorder %s299_s1, %s224_s27  ;;  %p228_p0 = scmp.lt.u32.totalorder %s224_s27, %s299_s1 }
 0x129   :  { %p230_p1 = pnand %p228_p0, %p225_p13 }
 0x12b   :  { %233 = shalt.err (!%p230_p1)
}
 0x12c   :  { %176 = dma.vmem_to_hbm [thread:$0]  %s171_s23, 512, %s299_s1, [#allocation5], %s239_s16, %s239_s16, %s240_s17  }
 0x12d   :  { %236 = dma.done.wait [#allocation5], 512  }
 0x12e   :  { %237 = vsyncadd [#allocation5], 4294966784 }
 0x12f   :  { %180 = vsyncpa [#allocation4], 1 }
 0x130   :  { %181 = vsyncpa [#allocation5], 1 }

</bundles_post_ra>
